<compile_context>
chip_gen: v7x
topology: tpu7x:2x2x1
jax: 0.10.0
libtpu: 0.0.40
codegen_flags: <defaults>
</compile_context>

<pallas_src>
import functools
import math

import jax
import jax.numpy as jnp
from jax.experimental import pallas as pl
from jax.experimental.pallas import tpu as pltpu

LOG_STD_MIN, LOG_STD_MAX = -10.0, 5.0
_LOG_2PI = math.log(2.0 * math.pi)
_LOG_2 = math.log(2.0)


def _softplus(z):
    # Numerically stable softplus: max(z, 0) + log1p(exp(-|z|)).
    return jnp.maximum(z, 0.0) + jnp.log1p(jnp.exp(-jnp.abs(z)))


def _actor_kernel(ac_dim, stochastic, *refs):
    if stochastic:
        (x_ref, eps_ref, w1_ref, b1_ref, w2_ref, b2_ref,
         wh_ref, bh_ref, out_ref) = refs
    else:
        (x_ref, w1_ref, b1_ref, w2_ref, b2_ref,
         wh_ref, bh_ref, out_ref) = refs

    x = x_ref[...]

    # --- MLP trunk (MXU matmuls, f32 accumulation; ReLU on the VPU) ---
    h = jnp.dot(x, w1_ref[...], preferred_element_type=jnp.float32) + b1_ref[...]
    h = jnp.maximum(h, 0.0)
    h = jnp.dot(h, w2_ref[...], preferred_element_type=jnp.float32) + b2_ref[...]
    h = jnp.maximum(h, 0.0)

    # --- fused mu / log_std head: one matmul, static slices to split ---
    p = jnp.dot(h, wh_ref[...], preferred_element_type=jnp.float32) + bh_ref[...]
    loc = p[:, :ac_dim]
    log_std = jnp.clip(p[:, ac_dim:], LOG_STD_MIN, LOG_STD_MAX)
    scale = _softplus(log_std)

    # --- reparameterized sample + Independent Normal log_prob ---
    # Note (a - loc) / scale == eps exactly, so no per-element divide is needed.
    if stochastic:
        eps = eps_ref[...]
        a = loc + scale * eps
        lp = -0.5 * eps * eps - jnp.log(scale) - 0.5 * jnp.float32(_LOG_2PI)
    else:
        a = loc
        lp = -jnp.log(scale) - 0.5 * jnp.float32(_LOG_2PI)
    logp = jnp.sum(lp, axis=-1, keepdims=True)

    # --- tanh-squash correction (apply_squash) ---
    corr = 2.0 * (jnp.float32(_LOG_2) - a - _softplus(-2.0 * a))
    logp = logp - jnp.sum(corr, axis=-1, keepdims=True)

    # --- single packed store: [tanh(a) | a | loc | scale | logp] ---
    packed = jnp.concatenate([jnp.tanh(a), a, loc, scale, logp], axis=-1)
    out_ref[...] = packed.astype(out_ref.dtype)


def _round_up(x, m):
    return (x + m - 1) // m * m


def _choose_batch_tile(B, tb_max=1024):
    # Bound padding waste: split into enough tiles that each is <= tb_max and
    # the last tile is nearly full; sublane-align (multiple of 8).
    n_tiles = max(1, -(-B // tb_max))
    if n_tiles == 1 and B >= 512:
        n_tiles = 2  # give multi-TC chips (v7x) >=2 independent tiles
    tb = _round_up(-(-B // n_tiles), 8)
    return tb


def squashed_gaussian_actor_forward(x, params, eps=None, deterministic=False):
    """Fused Pallas forward of SquashedGaussianMLPActor.

    Returns (tanh_action, logp_pi, pre_tanh_action, (loc, scale)).
    """
    w1, b1, w2, b2, wmu, bmu, wstd, bstd = params
    B, ob_dim = x.shape
    H = w1.shape[1]
    ac_dim = wmu.shape[1]

    # Fuse the two heads wrapper-side (free metadata / one-time under jit).
    wh = jnp.concatenate([wmu, wstd], axis=1)   # (H, 2*ac_dim)
    bh = jnp.concatenate([bmu, bstd], axis=1)   # (1, 2*ac_dim)

    stochastic = (not deterministic) and (eps is not None)

    tb = _choose_batch_tile(B)
    B_pad = _round_up(B, tb)
    if B_pad != B:
        x = jnp.pad(x, ((0, B_pad - B), (0, 0)))
        if stochastic:
            eps = jnp.pad(eps, ((0, B_pad - B), (0, 0)))

    out_width = 4 * ac_dim + 1  # act | pre | loc | scale | logp

    def batch_spec(d):
        return pl.BlockSpec((tb, d), lambda i: (i, 0))

    def resident_spec(shape):
        # Full array per grid step -> weights stay resident in VMEM.
        return pl.BlockSpec(shape, lambda i: (0, 0))

    in_specs = [batch_spec(ob_dim)]
    operands = [x]
    if stochastic:
        in_specs.append(batch_spec(ac_dim))
        operands.append(eps)
    in_specs += [
        resident_spec(w1.shape), resident_spec(b1.shape),
        resident_spec(w2.shape), resident_spec(b2.shape),
        resident_spec(wh.shape), resident_spec(bh.shape),
    ]
    operands += [w1, b1, w2, b2, wh, bh]

    packed = pl.pallas_call(
        functools.partial(_actor_kernel, ac_dim, stochastic),
        out_shape=jax.ShapeDtypeStruct((B_pad, out_width), jnp.float32),
        grid=(B_pad // tb,),
        in_specs=in_specs,
        out_specs=batch_spec(out_width),
        compiler_params=pltpu.CompilerParams(
            dimension_semantics=("parallel",),
        ),
    )(*operands)

    # Free metadata ops wrapper-side: drop padding, split packed columns.
    packed = packed[:B]
    act = packed[:, 0:ac_dim]
    pre = packed[:, ac_dim:2 * ac_dim]
    loc = packed[:, 2 * ac_dim:3 * ac_dim]
    scale = packed[:, 3 * ac_dim:4 * ac_dim]
    logp = packed[:, 4 * ac_dim]
    return act, logp, pre, (loc, scale)


def _reference(x, eps, w1, b1, w2, b2, wmu, bmu, wstd, bstd):
    """Pure-JAX reference mirroring the PyTorch forward."""
    h = jax.nn.relu(x @ w1 + b1)
    h = jax.nn.relu(h @ w2 + b2)
    loc = h @ wmu + bmu
    log_std = jnp.clip(h @ wstd + bstd, LOG_STD_MIN, LOG_STD_MAX)
    scale = jax.nn.softplus(log_std)
    a = loc + scale * eps
    lp = -0.5 * ((a - loc) / scale) ** 2 - jnp.log(scale) - 0.5 * _LOG_2PI
    logp = jnp.sum(lp, axis=-1)
    corr = 2.0 * (_LOG_2 - a - jax.nn.softplus(-2.0 * a))
    logp = logp - jnp.sum(corr, axis=-1)
    return jnp.tanh(a), logp, a, loc, scale


if __name__ == "__main__":
    key = jax.random.PRNGKey(0)
    B, OB, AC, H = 8, 16, 4, 32
    ks = jax.random.split(key, 12)

    def init(k, fan_in, shape):
        return jax.random.normal(k, shape, jnp.float32) / jnp.sqrt(jnp.float32(fan_in))

    w1 = init(ks[0], OB, (OB, H))
    b1 = init(ks[1], OB, (1, H))
    w2 = init(ks[2], H, (H, H))
    b2 = init(ks[3], H, (1, H))
    wmu = init(ks[4], H, (H, AC))
    bmu = init(ks[5], H, (1, AC))
    wstd = init(ks[6], H, (H, AC))
    bstd = init(ks[7], H, (1, AC))
    params = (w1, b1, w2, b2, wmu, bmu, wstd, bstd)

    x = jax.random.normal(ks[8], (B, OB), jnp.float32)
    eps = jax.random.normal(ks[9], (B, AC), jnp.float32)

    # Stochastic path (rsample with externally drawn noise).
    act, logp, pre, (loc, scale) = squashed_gaussian_actor_forward(x, params, eps=eps)
    jax.block_until_ready((act, logp, pre, loc, scale))

    r_act, r_logp, r_pre, r_loc, r_scale = _reference(x, eps, *params)
    for got, want in ((act, r_act), (logp, r_logp), (pre, r_pre),
                      (loc, r_loc), (scale, r_scale)):
        assert got.shape == want.shape, (got.shape, want.shape)
        assert bool(jnp.allclose(got, want, atol=1e-4, rtol=1e-4))

    # Deterministic path (action = distribution mean; no eps stream at all).
    act_d, logp_d, pre_d, _ = squashed_gaussian_actor_forward(
        x, params, deterministic=True)
    jax.block_until_ready((act_d, logp_d, pre_d))
    r_act_d, r_logp_d, _, _, _ = _reference(x, jnp.zeros((B, AC), jnp.float32), *params)
    assert bool(jnp.allclose(act_d, r_act_d, atol=1e-4, rtol=1e-4))
    assert bool(jnp.allclose(logp_d, r_logp_d, atol=1e-4, rtol=1e-4))

    # Non-aligned batch (exercises padding + slice-off path).
    B2 = 50
    x2 = jax.random.normal(ks[10], (B2, OB), jnp.float32)
    eps2 = jax.random.normal(ks[11], (B2, AC), jnp.float32)
    act2, logp2, pre2, (loc2, scale2) = squashed_gaussian_actor_forward(
        x2, params, eps=eps2)
    jax.block_until_ready((act2, logp2, pre2, loc2, scale2))
    r2 = _reference(x2, eps2, *params)
    for got, want in zip((act2, logp2, pre2, loc2, scale2), r2):
        assert got.shape == want.shape, (got.shape, want.shape)
        assert bool(jnp.allclose(got, want, atol=1e-4, rtol=1e-4))

    print("KERNEL_OK")
</pallas_src>

<mosaic_0001>
module attributes {stable_mosaic.version = 11 : i64} {
  func.func @_actor_kernel(%arg0: i32, %arg1: memref<8x16xf32, #tpu.memory_space<vmem>>, %arg2: memref<8x4xf32, #tpu.memory_space<vmem>>, %arg3: memref<16x32xf32, #tpu.memory_space<vmem>>, %arg4: memref<1x32xf32, #tpu.memory_space<vmem>>, %arg5: memref<32x32xf32, #tpu.memory_space<vmem>>, %arg6: memref<1x32xf32, #tpu.memory_space<vmem>>, %arg7: memref<32x8xf32, #tpu.memory_space<vmem>>, %arg8: memref<1x8xf32, #tpu.memory_space<vmem>>, %arg9: memref<8x17xf32, #tpu.memory_space<vmem>>) attributes {dimension_semantics = [#tpu.dimension_semantics<parallel>], iteration_bounds = array<i64: 1>, scalar_prefetch = 0 : i64, scratch_operands = 0 : i64, tpu.core_type = #tpu.core_type<tc>, window_params = [{transform_indices = @transform_0, window_bounds = array<i64: 8, 16>}, {transform_indices = @transform_1, window_bounds = array<i64: 8, 4>}, {pipeline_mode = #tpu.pipeline_mode<synchronous>, transform_indices = @transform_2, window_bounds = array<i64: 16, 32>}, {pipeline_mode = #tpu.pipeline_mode<synchronous>, transform_indices = @transform_3, window_bounds = array<i64: 1, 32>}, {pipeline_mode = #tpu.pipeline_mode<synchronous>, transform_indices = @transform_4, window_bounds = array<i64: 32, 32>}, {pipeline_mode = #tpu.pipeline_mode<synchronous>, transform_indices = @transform_5, window_bounds = array<i64: 1, 32>}, {pipeline_mode = #tpu.pipeline_mode<synchronous>, transform_indices = @transform_6, window_bounds = array<i64: 32, 8>}, {pipeline_mode = #tpu.pipeline_mode<synchronous>, transform_indices = @transform_7, window_bounds = array<i64: 1, 8>}, {transform_indices = @transform_8, window_bounds = array<i64: 8, 17>}]} {
    %c0 = arith.constant 0 : index
    %c0_0 = arith.constant 0 : index
    %0 = vector.load %arg1[%c0, %c0_0] : memref<8x16xf32, #tpu.memory_space<vmem>>, vector<8x16xf32>
    %c0_1 = arith.constant 0 : index
    %c0_2 = arith.constant 0 : index
    %1 = vector.load %arg3[%c0_1, %c0_2] : memref<16x32xf32, #tpu.memory_space<vmem>>, vector<16x32xf32>
    %cst = arith.constant dense<0.000000e+00> : vector<8x32xf32>
    %2 = tpu.matmul %0, %1, %cst {dimension_numbers = #tpu.dot_dimension_numbers<[1], [0], [0], [1], [0, 0, 1, 1], [], []>} : vector<8x16xf32>, vector<16x32xf32>, vector<8x32xf32> -> vector<8x32xf32>
    %c0_3 = arith.constant 0 : index
    %c0_4 = arith.constant 0 : index
    %3 = vector.load %arg4[%c0_3, %c0_4] : memref<1x32xf32, #tpu.memory_space<vmem>>, vector<1x32xf32>
    %4 = vector.broadcast %3 : vector<1x32xf32> to vector<8x32xf32>
    %5 = arith.addf %2, %4 : vector<8x32xf32>
    %cst_5 = arith.constant 0.000000e+00 : f32
    %6 = vector.broadcast %cst_5 : f32 to vector<8x32xf32>
    %7 = arith.maximumf %5, %6 : vector<8x32xf32>
    %c0_6 = arith.constant 0 : index
    %c0_7 = arith.constant 0 : index
    %8 = vector.load %arg5[%c0_6, %c0_7] : memref<32x32xf32, #tpu.memory_space<vmem>>, vector<32x32xf32>
    %cst_8 = arith.constant dense<0.000000e+00> : vector<8x32xf32>
    %9 = tpu.matmul %7, %8, %cst_8 {dimension_numbers = #tpu.dot_dimension_numbers<[1], [0], [0], [1], [0, 0, 1, 1], [], []>} : vector<8x32xf32>, vector<32x32xf32>, vector<8x32xf32> -> vector<8x32xf32>
    %c0_9 = arith.constant 0 : index
    %c0_10 = arith.constant 0 : index
    %10 = vector.load %arg6[%c0_9, %c0_10] : memref<1x32xf32, #tpu.memory_space<vmem>>, vector<1x32xf32>
    %11 = vector.broadcast %10 : vector<1x32xf32> to vector<8x32xf32>
    %12 = arith.addf %9, %11 : vector<8x32xf32>
    %cst_11 = arith.constant 0.000000e+00 : f32
    %13 = vector.broadcast %cst_11 : f32 to vector<8x32xf32>
    %14 = arith.maximumf %12, %13 : vector<8x32xf32>
    %c0_12 = arith.constant 0 : index
    %c0_13 = arith.constant 0 : index
    %15 = vector.load %arg7[%c0_12, %c0_13] : memref<32x8xf32, #tpu.memory_space<vmem>>, vector<32x8xf32>
    %cst_14 = arith.constant dense<0.000000e+00> : vector<8x8xf32>
    %16 = tpu.matmul %14, %15, %cst_14 {dimension_numbers = #tpu.dot_dimension_numbers<[1], [0], [0], [1], [0, 0, 1, 1], [], []>} : vector<8x32xf32>, vector<32x8xf32>, vector<8x8xf32> -> vector<8x8xf32>
    %c0_15 = arith.constant 0 : index
    %c0_16 = arith.constant 0 : index
    %17 = vector.load %arg8[%c0_15, %c0_16] : memref<1x8xf32, #tpu.memory_space<vmem>>, vector<1x8xf32>
    %18 = vector.broadcast %17 : vector<1x8xf32> to vector<8x8xf32>
    %19 = arith.addf %16, %18 : vector<8x8xf32>
    %20 = vector.extract_strided_slice %19 {offsets = [0, 0], sizes = [8, 4], strides = [1, 1]} : vector<8x8xf32> to vector<8x4xf32>
    %21 = vector.extract_strided_slice %19 {offsets = [0, 4], sizes = [8, 4], strides = [1, 1]} : vector<8x8xf32> to vector<8x4xf32>
    %cst_17 = arith.constant -1.000000e+01 : f32
    %cst_18 = arith.constant 5.000000e+00 : f32
    %22 = vector.broadcast %cst_17 : f32 to vector<8x4xf32>
    %23 = arith.maximumf %22, %21 : vector<8x4xf32>
    %24 = vector.broadcast %cst_18 : f32 to vector<8x4xf32>
    %25 = arith.minimumf %24, %23 : vector<8x4xf32>
    %cst_19 = arith.constant 0.000000e+00 : f32
    %26 = vector.broadcast %cst_19 : f32 to vector<8x4xf32>
    %27 = arith.maximumf %25, %26 : vector<8x4xf32>
    %28 = math.absf %25 : vector<8x4xf32>
    %cst_20 = arith.constant 0.000000e+00 : f32
    %29 = vector.broadcast %cst_20 : f32 to vector<8x4xf32>
    %30 = arith.subf %29, %28 : vector<8x4xf32>
    %31 = math.exp %30 : vector<8x4xf32>
    %32 = math.log1p %31 : vector<8x4xf32>
    %33 = arith.addf %27, %32 : vector<8x4xf32>
    %c0_21 = arith.constant 0 : index
    %c0_22 = arith.constant 0 : index
    %34 = vector.load %arg2[%c0_21, %c0_22] : memref<8x4xf32, #tpu.memory_space<vmem>>, vector<8x4xf32>
    %35 = arith.mulf %33, %34 : vector<8x4xf32>
    %36 = arith.addf %20, %35 : vector<8x4xf32>
    %cst_23 = arith.constant -5.000000e-01 : f32
    %37 = vector.broadcast %cst_23 : f32 to vector<8x4xf32>
    %38 = arith.mulf %37, %34 : vector<8x4xf32>
    %39 = arith.mulf %38, %34 : vector<8x4xf32>
    %40 = math.log %33 : vector<8x4xf32>
    %41 = arith.subf %39, %40 : vector<8x4xf32>
    %cst_24 = arith.constant 5.000000e-01 : f32
    %cst_25 = arith.constant 1.83787704 : f32
    %42 = arith.mulf %cst_24, %cst_25 : f32
    %43 = vector.broadcast %42 : f32 to vector<8x4xf32>
    %44 = arith.subf %41, %43 : vector<8x4xf32>
    %cst_26 = arith.constant dense<0.000000e+00> : vector<8xf32>
    %45 = vector.multi_reduction <add>, %44, %cst_26 [1] : vector<8x4xf32> to vector<8xf32>
    %46 = vector.shape_cast %45 : vector<8xf32> to vector<8x1xf32>
    %cst_27 = arith.constant 0.693147182 : f32
    %47 = vector.broadcast %cst_27 : f32 to vector<8x4xf32>
    %48 = arith.subf %47, %36 : vector<8x4xf32>
    %cst_28 = arith.constant -2.000000e+00 : f32
    %49 = vector.broadcast %cst_28 : f32 to vector<8x4xf32>
    %50 = arith.mulf %49, %36 : vector<8x4xf32>
    %cst_29 = arith.constant 0.000000e+00 : f32
    %51 = vector.broadcast %cst_29 : f32 to vector<8x4xf32>
    %52 = arith.maximumf %50, %51 : vector<8x4xf32>
    %53 = math.absf %50 : vector<8x4xf32>
    %cst_30 = arith.constant 0.000000e+00 : f32
    %54 = vector.broadcast %cst_30 : f32 to vector<8x4xf32>
    %55 = arith.subf %54, %53 : vector<8x4xf32>
    %56 = math.exp %55 : vector<8x4xf32>
    %57 = math.log1p %56 : vector<8x4xf32>
    %58 = arith.addf %52, %57 : vector<8x4xf32>
    %59 = arith.subf %48, %58 : vector<8x4xf32>
    %cst_31 = arith.constant 2.000000e+00 : f32
    %60 = vector.broadcast %cst_31 : f32 to vector<8x4xf32>
    %61 = arith.mulf %60, %59 : vector<8x4xf32>
    %cst_32 = arith.constant dense<0.000000e+00> : vector<8xf32>
    %62 = vector.multi_reduction <add>, %61, %cst_32 [1] : vector<8x4xf32> to vector<8xf32>
    %63 = vector.shape_cast %62 : vector<8xf32> to vector<8x1xf32>
    %64 = arith.subf %46, %63 : vector<8x1xf32>
    %65 = math.tanh %36 : vector<8x4xf32>
    %66 = tpu.concatenate %65, %36, %20, %33, %64 in 1 : vector<8x4xf32>, vector<8x4xf32>, vector<8x4xf32>, vector<8x4xf32>, vector<8x1xf32> -> vector<8x17xf32>
    %c0_33 = arith.constant 0 : index
    %c0_34 = arith.constant 0 : index
    %67 = vector.load %arg9[%c0_33, %c0_34] : memref<8x17xf32, #tpu.memory_space<vmem>>, vector<8x17xf32>
    tpu.vector_store %arg9[%c0_33, %c0_34], %66 {strides = array<i32>} : memref<8x17xf32, #tpu.memory_space<vmem>>, vector<8x17xf32>,
    return
  }
  func.func @transform_0(%arg0: i32) -> (i32, i32) {
    %c0_i32 = arith.constant 0 : i32
    %c0_i32_0 = arith.constant 0 : i32
    return %arg0, %c0_i32 : i32, i32
  }
  func.func @transform_1(%arg0: i32) -> (i32, i32) {
    %c0_i32 = arith.constant 0 : i32
    %c0_i32_0 = arith.constant 0 : i32
    return %arg0, %c0_i32 : i32, i32
  }
  func.func @transform_2(%arg0: i32) -> (i32, i32) {
    %c0_i32 = arith.constant 0 : i32
    %c0_i32_0 = arith.constant 0 : i32
    %c0_i32_1 = arith.constant 0 : i32
    return %c0_i32, %c0_i32_0 : i32, i32
  }
  func.func @transform_3(%arg0: i32) -> (i32, i32) {
    %c0_i32 = arith.constant 0 : i32
    %c0_i32_0 = arith.constant 0 : i32
    %c0_i32_1 = arith.constant 0 : i32
    return %c0_i32, %c0_i32_0 : i32, i32
  }
  func.func @transform_4(%arg0: i32) -> (i32, i32) {
    %c0_i32 = arith.constant 0 : i32
    %c0_i32_0 = arith.constant 0 : i32
    %c0_i32_1 = arith.constant 0 : i32
    return %c0_i32, %c0_i32_0 : i32, i32
  }
  func.func @transform_5(%arg0: i32) -> (i32, i32) {
    %c0_i32 = arith.constant 0 : i32
    %c0_i32_0 = arith.constant 0 : i32
    %c0_i32_1 = arith.constant 0 : i32
    return %c0_i32, %c0_i32_0 : i32, i32
  }
  func.func @transform_6(%arg0: i32) -> (i32, i32) {
    %c0_i32 = arith.constant 0 : i32
    %c0_i32_0 = arith.constant 0 : i32
    %c0_i32_1 = arith.constant 0 : i32
    return %c0_i32, %c0_i32_0 : i32, i32
  }
  func.func @transform_7(%arg0: i32) -> (i32, i32) {
    %c0_i32 = arith.constant 0 : i32
    %c0_i32_0 = arith.constant 0 : i32
    %c0_i32_1 = arith.constant 0 : i32
    return %c0_i32, %c0_i32_0 : i32, i32
  }
  func.func @transform_8(%arg0: i32) -> (i32, i32) {
    %c0_i32 = arith.constant 0 : i32
    %c0_i32_0 = arith.constant 0 : i32
    return %arg0, %c0_i32 : i32, i32
  }
}

</mosaic_0001>

<bundles_post_ra>
// kernel: tpu_custom_call.1
= control target key start
LH: loop header
LB: loop body
LE: loop exit
PB: predicated region body
PF: predicated region fallthrough
CT: control target
= control target key end

     0   :  { %v492_v2 = vmov 0.0|0.0   ;;  %vm493_vm0 = vmmov 0   ;;  %v494_v4 = vmov 0.0   ;;  %s611_s0 = inlined_call_operand.vmem [shape: f32[8,16], index: 0, kind: input, shape index: {}]   ;;  %s612_s1 = inlined_call_operand.vmem [shape: f32[8,4], index: 1, kind: input, shape index: {}]   ;;  %s613_s2 = inlined_call_operand.vmem [shape: f32[16,32], index: 2, kind: input, shape index: {}]   ;;  %s614_s3 = inlined_call_operand.vmem [shape: f32[1,32], index: 3, kind: input, shape index: {}]   ;;  %s615_s4 = inlined_call_operand.vmem [shape: f32[32,32], index: 4, kind: input, shape index: {}]   ;;  %s616_s5 = inlined_call_operand.vmem [shape: f32[1,32], index: 5, kind: input, shape index: {}]   ;;  %s617_s6 = inlined_call_operand.vmem [shape: f32[32,8], index: 6, kind: input, shape index: {}]   ;;  %s618_s7 = inlined_call_operand.vmem [shape: f32[1,8], index: 7, kind: input, shape index: {}]   ;;  %s619_s8 = inlined_call_operand.hbm [shape: f32[8,17], index: 8, kind: output, shape index: {}]  }
   0x1   :  { %v31_v0 = vld [vmem:[%s613_s2] sm:$0xff]  ;;  %v32_v1 = vld [vmem:[%s613_s2 + $0x8] sm:$0xff]  ;;  %434 = vmatprep.subr.bf16.mxu0 %v492_v2  ;;  %409 = vmatprep.mubr.msk.f32.mxu0 %vm493_vm0, %v494_v4 }
   0x2   :  { %v435_v3 = vpack.c.bf16 %v32_v1, %v31_v0  ;;  %v115_v5 = vld [vmem:[%s615_s4] sm:$0xff]  ;;  %v116_v6 = vld [vmem:[%s615_s4 + $0x8] sm:$0xff]  ;;  %437 = vmatprep.subr.bf16.mxu1 %v492_v2  ;;  %420 = vmatprep.mubr.msk.f32.mxu1 %vm493_vm0, %v494_v4 }
   0x3   :  { %v438_v7 = vpack.c.bf16 %v116_v6, %v115_v5 }
   0x4   :  { %13 = vsyncpa [#allocation3], 0  ;;  %436 = vmatpush3.bf16.msra.mxu0 %v435_v3  ;;  %v30_v8 = vld [vmem:[%s611_s0] sm:$0xff]  ;;  %vm40_vm1 = vcmask 130048   ;;  %v117_v9 = vld [vmem:[%s615_s4 + $0x10] sm:$0xff]  ;;  %vm126_vm2 = vcmask 261120  }
   0x5   :  { %439 = vmatpush3.bf16.msra.mxu1 %v438_v7  ;;  %443 = vmatprep.subr.bf16.mxu0 %v492_v2  ;;  %v118_v10 = vld [vmem:[%s615_s4 + $0x18] sm:$0xff]  ;;  %v201_v12 = vld [vmem:[%s617_s6] sm:$0xff]  ;;  %v202_v13 = vld [vmem:[%s617_s6 + $0x8] sm:$0xff]  ;;  %vm323_vm4 = vcmask 31744   ;;  %vm364_vm6 = vcmask 64512   ;;  %vm366_vm7 = vcmask 97280  }
   0x6   :  { %440 = vmatprep.subr.bf16.mxu1 %v492_v2  ;;  %v441_v11 = vpack.c.bf16 %v118_v10, %v117_v9  ;;  %v444_v14 = vpack.c.bf16 %v202_v13, %v201_v12  ;;  %v385_v15 = vld [vmem:[%s614_s3] ss:$0 sm:$0xff]  ;;  %v203_v20 = vld [vmem:[%s617_s6 + $0x10] sm:$0xff]  ;;  %v204_v21 = vld [vmem:[%s617_s6 + $0x18] sm:$0xff]  ;;  %s495_s3 = smov 4   ;;  %vm369_vm8 = vcmask 138240  }
   0x7   :  { %410 = vmatmul.mubr.msk.f32.vlgmr.msra.gmra.mrb[0].mxu0 %vm40_vm1, %v30_v8  ;;  %v447_v22 = vpack.c.bf16 %v204_v21, %v203_v20  ;;  %v302_v23 = vld [vmem:[%s612_s1] sm:$0xff]  ;;  %s496_s1 = smov 124  }
   0x8   :  { %431 = vmatprep.mubr.msk.f32.mxu0 %vm493_vm0, %v494_v4  ;;  %445 = vmatpush3.bf16.msra.mxu0 %v444_v14  ;;  %v387_v24 = vld [vmem:[%s616_s5] ss:$0 sm:$0xff]  ;;  %v313_v56 = vmul.f32 -0.5, %v302_v23  ;;  %s497_s5 = smov 8  }
   0x9   :  { %442 = vmatpush3.bf16.msra.mxu1 %v441_v11  ;;  %446 = vmatprep.subr.bf16.mxu0 %v492_v2  ;;  %v389_v29 = vld [vmem:[%s618_s7] ss:$0 sm:$0xff]  ;;  %s498_s7 = smov [#allocation2]  }
   0xa   :  { %304 = vrot.lane.b32.xlu0 %v302_v23, %s495_s3  ;;  %v314_v59 = vmul.f32 %v313_v56, %v302_v23  ;;  %s377_s9 = sshll.u32 %s498_s7, 4  ;;  %s378_s9 = int_to_ptr.vmem [resolvable:$true] %s377_s9 }
   0xb   :  { %s468_s10 = scalar_lea.vmem %s378_s9, 128  ;;  %p473_p1 = scmp.lt.s32.totalorder %s378_s9, %s378_s9 }
   0xc   :  { %448 = vmatpush3.bf16.msra.mxu0 %v447_v22  ;;  %p469_p0 = scmp.ne.s32.totalorder %s378_s9, %s468_s10  ;;  %p474_p2 = scmp.lt.s32.totalorder %s468_s10, %s468_s10 }
   0xe   :  { %p475_p3 = por %p474_p2, %p473_p1 }
  0x10   :  { %p476_p4 = pnand %p475_p3, %p469_p0 }
  0x7c   :  { %v305_v47 = vpop.permute.xlu0 %304 }
  0xda   :  { %v110_v16 = vpop.f32.mrb[0].mxu0 }
  0xdb   :  { %v111_v17 = vadd.f32 %v385_v15, %v110_v16  ;;  %v411_v18 = vpop.f32.mrb[1].mxu0 }
  0xdd   :  { %v114_v19 = vmax.f32 %v111_v17, 0.0 }
  0xdf   :  { %421 = vmatmul.mubr.msk.f32.vlgmr.msra.gmra.mrb[0].mxu1 %vm126_vm2, %v114_v19 }
 0x1b2   :  { %v196_v25 = vpop.f32.mrb[0].mxu1 }
 0x1b3   :  { %v197_v26 = vadd.f32 %v387_v24, %v196_v25  ;;  %v422_v27 = vpop.f32.mrb[1].mxu1 }
 0x1b5   :  { %v200_v28 = vmax.f32 %v197_v26, 0.0 }
 0x1b7   :  { %432 = vmatmul.mubr.msk.f32.vlgmr.msra.gmra.mrb[2].mxu0 %vm126_vm2, %v200_v28 }
 0x28a   :  { %v281_v30 = vpop.f32.mrb[2].mxu0 }
 0x28b   :  { %v282_v31 = vadd.f32 %v389_v29, %v281_v30  ;;  %v433_v32 = vpop.f32.mrb[3].mxu0 }
 0x28d   :  { %v285_v33 = vmax.f32 %v282_v31, -10.0 }
 0x28f   :  { %v286_v34 = vmin.f32 %v285_v33, 5.0 }
 0x291   :  { %v288_v35 = vand.u32 2147483647, %v286_v34  ;;  %v287_v46 = vmax.f32 %v286_v34, 0.0 }
 0x293   :  { %v289_v36 = vsub.f32 0.0, %v288_v35 }
 0x295   :  { %v290_v37 = vmul.f32 1.442695, %v289_v36 }
 0x297   :  { %456 = vpow2.f32 %v290_v37 }
 0x2a1   :  { %v457_v38 = vpop.eup %456 }
 0x2a2   :  { %v292_v39 = vadd.f32 1.0, %v457_v38  ;;  %v295_v40 = vmul.f32 -0.5, %v457_v38  ;;  %v298_v42 = vand.u32 2147483647, %v457_v38 }
 0x2a4   :  { %458 = vlog2.f32 %v292_v39  ;;  %v296_v41 = vadd.f32 1.0, %v295_v40  ;;  %vm299_vm3 = vcmp.lt.f32.partialorder %v298_v42, 0.0004427343 }
 0x2a6   :  { %v297_v45 = vmul.f32 %v457_v38, %v296_v41 }
 0x2ae   :  { %v459_v43 = vpop.eup %458 }
 0x2af   :  { %v294_v44 = vmul.f32 0.6931472, %v459_v43 }
 0x2b1   :  { %v300_v48 = vsel %vm299_vm3, %v297_v45, %v294_v44 }
 0x2b2   :  { %v301_v49 = vadd.f32 %v300_v48, %v287_v46 }
 0x2b4   :  { %v307_v50 = vmul.f32 %v305_v47, %v301_v49  ;;  %460 = vlog2.f32 %v301_v49 }
 0x2b6   :  { %309 = vrot.lane.b32.xlu0 %v307_v50, %s496_s1 }
 0x2be   :  { %v461_v51 = vpop.eup %460 }
 0x2bf   :  { %v316_v52 = vmul.f32 0.6931472, %v461_v51 }
 0x2c1   :  { %318 = vrot.lane.b32.xlu1 %v316_v52, %s496_s1 }
 0x328   :  { %v310_v53 = vpop.permute.xlu0 %309 }
 0x329   :  { %v312_v54 = vadd.f32 %v310_v53, %v282_v31 }
 0x32b   :  { %v328_v55 = vmul.f32 -2.0, %v312_v54  ;;  %v327_v11 = vsub.f32 0.6931472, %v312_v54 }
 0x32d   :  { %v330_v57 = vand.u32 2147483647, %v328_v55  ;;  %v329_v9 = vmax.f32 %v328_v55, 0.0 }
 0x32f   :  { %v331_v58 = vsub.f32 0.0, %v330_v57 }
 0x331   :  { %v332_v60 = vmul.f32 1.442695, %v331_v58 }
 0x333   :  { %462 = vpow2.f32 %v332_v60  ;;  %v319_v61 = vpop.permute.xlu1 %318 }
 0x334   :  { %v321_v62 = vsub.f32 %v314_v59, %v319_v61 }
 0x336   :  { %v391_v63 = vadd.f32 -0.9189385, %v321_v62 }
 0x338   :  { %v324_v0 = vsel %vm323_vm4, %v391_v63, 0.0 }
 0x339   :  { %325 = vadd.xlane.f32.xlu1 %v324_v0 }
 0x33d   :  { %v463_v1 = vpop.eup %462 }
 0x33e   :  { %v334_v2 = vadd.f32 1.0, %v463_v1  ;;  %v337_v3 = vmul.f32 -0.5, %v463_v1  ;;  %v340_v5 = vand.u32 2147483647, %v463_v1 }
 0x340   :  { %464 = vlog2.f32 %v334_v2  ;;  %v338_v4 = vadd.f32 1.0, %v337_v3  ;;  %vm341_vm5 = vcmp.lt.f32.partialorder %v340_v5, 0.0004427343 }
 0x341   :  { %466 = vtanh.f32 %v312_v54 }
 0x342   :  { %v339_v8 = vmul.f32 %v463_v1, %v338_v4 }
 0x34a   :  { %v465_v6 = vpop.eup %464  ;;  %356 = vrot.lane.b32.xlu1 %v282_v31, %s497_s5 }
 0x34b   :  { %v336_v7 = vmul.f32 0.6931472, %v465_v6  ;;  %v467_v19 = vpop.eup %466 }
 0x34d   :  { %v342_v10 = vsel %vm341_vm5, %v339_v8, %v336_v7 }
 0x34e   :  { %360 = vrot.lane.b32.xlu1 %v301_v49, %s497_s5  ;;  %v343_v12 = vadd.f32 %v342_v10, %v329_v9 }
 0x350   :  { %v344_v13 = vsub.f32 %v327_v11, %v343_v12 }
 0x352   :  { %v345_v14 = vmul.f32 2.0, %v344_v13 }
 0x354   :  { %v346_v15 = vsel %vm323_vm4, %v345_v14, 0.0 }
 0x355   :  { %347 = vadd.xlane.f32.xlu0 %v346_v15 }
 0x36b   :  { %352 = vrot.lane.b32.xlu0 %v312_v54, %s495_s3 }
 0x3c6   :  { %v326_v16 = vpop.xlane.xlu1 %325 }
 0x3ca   :  { %v357_v17 = vpop.permute.xlu1 %356 }
 0x3ce   :  { %v361_v22 = vpop.permute.xlu1 %360 }
 0x3e2   :  { %v348_v18 = vpop.xlane.xlu0 %347 }
 0x3e3   :  { %v349_v23 = vsub.f32 %v326_v16, %v348_v18 }
 0x3e6   :  { %v353_v20 = vpop.permute.xlu0 %352 }
 0x3e7   :  { %v363_v21 = vsel %vm323_vm4, %v467_v19, %v353_v20 }
 0x3e8   :  { %v365_v24 = vsel %vm364_vm6, %v363_v21, %v357_v17 }
 0x3e9   :  { %v367_v25 = vsel %vm366_vm7, %v365_v24, %v361_v22 }
 0x3ea   :  { %v368_v26 = vsel %vm40_vm1, %v367_v25, %v349_v23 }
 0x3eb   :  { %370 = vst.msk [vmem:[#allocation2] sm:$0xff] %vm369_vm8, %v368_v26 }
 0x3ec   :  { %479 = shalt.err (!%p476_p4)
}
 0x3ed   :  { %s480_s2 = scalar_lea.hbm %s619_s8, 128 }
 0x3ee   :  { %p481_p5 = scmp.ne.s32.totalorder %s619_s8, %s480_s2  ;;  %p484_p6 = scmp.lt.u32.totalorder %s480_s2, %s619_s8 }
 0x3f0   :  { %p486_p7 = pnand %p484_p6, %p481_p5 }
 0x3f2   :  { %489 = shalt.err (!%p486_p7)
}
 0x3f3   :  { %380 = dma.vmem_to_hbm [thread:$0]  %s378_s9, 128, %s619_s8, [#allocation3]  }
 0x3f4   :  { %490 = dma.done.wait [#allocation3], 128  }
 0x3f5   :  { %491 = vsyncadd [#allocation3], 4294967168 }
 0x3f6   :  { %384 = vsyncpa [#allocation3], 1 }

</bundles_post_ra>
